<compile_context>
chip_gen: v7x
topology: tpu7x:2x2x1
jax: 0.10.0
libtpu: 0.0.40
codegen_flags: <defaults>
</compile_context>

<pallas_src>
import jax
import jax.numpy as jnp
from jax.experimental import pallas as pl
from jax.experimental.pallas import tpu as pltpu


# ----------------------------- model dimensions -----------------------------
IN, H1, H2, H3, OUT = 3, 32, 64, 32, 3
LANES = 128  # lane width of every packed weight view / activation block

# ------------------------- packed parameter blob layout ---------------------
# Row offsets inside the (BLOB_ROWS, 128) blob.  Each view read by the kernel
# starts at a multiple of 8 rows and spans all 128 lanes (full-tile loads).
#
# Overlap trick (exact): h1 lanes 64:128 and h3 lanes 64:128 are guaranteed
# zero (their weight columns and bias lanes are zero and ReLU(0)=0), so the
# K-rows of the W2 / Wf views that correspond to those lanes multiply by zero
# and may physically hold the next view's data.
OFF_W1A = 0                     # rows 0:3   = w1_folded  -> lanes 0:32   (tower A / x)
OFF_W1B = 8                     # rows 8:11  = w1_folded  -> lanes 32:64  (tower B / features)
OFF_B = 16                      # rows 16:19 = b1bd, b2bd, b3bd, b_final
OFF_W2 = 24                     # view rows 24:152 ; live rows 24:88  (W2 block-diag)
OFF_WF = OFF_W2 + 2 * H1        # 88 ; view rows 88:216 ; live rows 88:152 (fused final)
OFF_W3 = OFF_WF + 2 * H3        # 152; view rows 152:280; all 128 rows live (W3 block-diag)
BLOB_ROWS = OFF_W3 + 2 * H2     # 280 rows x 128 lanes x 4 B ~= 140 KiB


# --------------------------------- kernel -----------------------------------
def _force_model_kernel(x_ref, f_ref, p_ref, out_ref):
    """Fused forward for one row-block.

    x_ref, f_ref : (rows, IN)  float32
    p_ref        : (BLOB_ROWS, LANES) packed, BN-folded parameters
    out_ref      : (rows, LANES) float32 (only lanes 0:OUT are live)
    """
    # ---- parameter views: sublane-aligned, full-128-lane loads -------------
    w1a = p_ref[OFF_W1A:OFF_W1A + IN, :]      # (3,128)  lanes 0:32 live
    w1b = p_ref[OFF_W1B:OFF_W1B + IN, :]      # (3,128)  lanes 32:64 live
    bias = p_ref[OFF_B:OFF_B + 8, :]          # (8,128)  full-tile load
    w2 = p_ref[OFF_W2:OFF_W2 + LANES, :]      # (128,128) K-rows 64:128 hit zero h1 lanes
    wf = p_ref[OFF_WF:OFF_WF + LANES, :]      # (128,128) K-rows 64:128 hit zero h3 lanes
    w3 = p_ref[OFF_W3:OFF_W3 + LANES, :]      # (128,128) all K-rows live

    b1 = bias[0:1, :]
    b2 = bias[1:2, :]
    b3 = bias[2:3, :]
    bf = bias[3:4, :]

    x = x_ref[...]                            # (rows, 3)
    f = f_ref[...]                            # (rows, 3)

    # Layer 1 (+folded BN1) + ReLU  (Dropout = identity in eval mode).
    # Two tiny dots place tower A into lanes 0:32 and tower B into lanes
    # 32:64 of one 128-lane activation block; lanes 64:128 stay exactly 0.
    h = (jnp.dot(x, w1a, preferred_element_type=jnp.float32)
         + jnp.dot(f, w1b, preferred_element_type=jnp.float32) + b1)
    h = jnp.maximum(h, 0.0)

    # Layer 2 (+folded BN2) + LeakyReLU(0.01) — one full-width dot.
    h = jnp.dot(h, w2, preferred_element_type=jnp.float32) + b2
    h = jnp.maximum(h, 0.01 * h)

    # Layer 3 (+folded BN3) + ReLU — one full-width dot.
    h = jnp.dot(h, w3, preferred_element_type=jnp.float32) + b3
    h = jnp.maximum(h, 0.0)

    # Tower head fused with sum_features — one dot, lane-dense store
    # (lanes OUT:128 are exact zeros coming from the zero-padded weights).
    out = jnp.dot(h, wf, preferred_element_type=jnp.float32) + bf
    out_ref[...] = out.astype(out_ref.dtype)


# -------------------------------- wrapper ------------------------------------
def force_model_forward(x, features, param_blob, *, max_rows_per_block=1024):
    """x, features: [B, IN] f32; param_blob: packed (BLOB_ROWS, LANES) f32."""
    B = x.shape[0]
    bm = B if B <= max_rows_per_block else max_rows_per_block
    n_blocks = pl.cdiv(B, bm)
    Bp = n_blocks * bm
    if Bp != B:  # only the large-batch gridded path ever pads
        x = jnp.pad(x, ((0, Bp - B), (0, 0)))
        features = jnp.pad(features, ((0, Bp - B), (0, 0)))

    flops = Bp * (2 * 2 * IN * LANES + 3 * 2 * LANES * LANES)
    bytes_accessed = 4 * (2 * Bp * IN + BLOB_ROWS * LANES + Bp * LANES)

    out = pl.pallas_call(
        _force_model_kernel,
        out_shape=jax.ShapeDtypeStruct((Bp, LANES), jnp.float32),
        grid=(n_blocks,),
        in_specs=[
            pl.BlockSpec((bm, IN), lambda i: (i, 0)),
            pl.BlockSpec((bm, IN), lambda i: (i, 0)),
            # constant block index -> blob stays resident across the grid
            pl.BlockSpec((BLOB_ROWS, LANES), lambda i: (0, 0)),
        ],
        out_specs=pl.BlockSpec((bm, LANES), lambda i: (i, 0)),
        compiler_params=pltpu.CompilerParams(
            dimension_semantics=("parallel",)),
        cost_estimate=pl.CostEstimate(
            flops=flops, transcendentals=0, bytes_accessed=bytes_accessed),
    )(x, features, param_blob)

    # Lane-dense kernel output; only the first OUT lanes / first B rows live.
    return out[:B, :OUT]


# ------------------------ parameter init / packing ---------------------------
def init_params(key, eps=1e-5):
    """Deterministic synthetic parameters (PyTorch-layout equivalents)."""
    ks = iter(jax.random.split(key, 32))

    def linear(i, o):
        # stored transposed relative to torch: (in, out)
        w = jax.random.normal(next(ks), (i, o), jnp.float32) * 0.1
        b = jax.random.normal(next(ks), (1, o), jnp.float32) * 0.1
        return w, b

    def bn(d):
        gamma = 1.0 + 0.1 * jax.random.normal(next(ks), (1, d), jnp.float32)
        beta = 0.1 * jax.random.normal(next(ks), (1, d), jnp.float32)
        mean = 0.1 * jax.random.normal(next(ks), (1, d), jnp.float32)
        var = jax.random.uniform(next(ks), (1, d), jnp.float32,
                                 minval=0.5, maxval=1.5)
        scale = gamma / jnp.sqrt(var + eps)
        shift = beta - mean * scale
        return scale, shift

    w1, b1 = linear(IN, H1); s1, t1 = bn(H1)
    w2, b2 = linear(H1, H2); s2, t2 = bn(H2)
    w3, b3 = linear(H2, H3); s3, t3 = bn(H3)
    w4, b4 = linear(H3, OUT)
    w5, b5 = linear(IN * 2, OUT)   # sum_features: Linear(2*IN, 3)

    raw = dict(w1=w1, b1=b1, s1=s1, t1=t1, w2=w2, b2=b2, s2=s2, t2=t2,
               w3=w3, b3=b3, s3=s3, t3=t3, w4=w4, b4=b4, w5=w5, b5=b5)
    return raw, pack_params(raw)


def pack_params(p):
    """Fold BN into Linears, fuse w4 with w5, pack block-diagonal lane-stacked
    weights into one (BLOB_ROWS, 128) blob.  All .set() row ranges are disjoint;
    overlaps only exist between kernel *views* on rows that multiply
    guaranteed-zero activation lanes."""
    # BN folding: (xW + b)*s + t == x(W*s) + (b*s + t)
    w1f = p["w1"] * p["s1"]; b1f = p["b1"] * p["s1"] + p["t1"]
    w2f = p["w2"] * p["s2"]; b2f = p["b2"] * p["s2"] + p["t2"]
    w3f = p["w3"] * p["s3"]; b3f = p["b3"] * p["s3"] + p["t3"]

    # Fuse tower-final Linear with sum_features (exact; no nonlinearity between).
    w5a, w5b = p["w5"][:OUT, :], p["w5"][OUT:, :]
    w45a = p["w4"] @ w5a                       # (H3, OUT)
    w45b = p["w4"] @ w5b                       # (H3, OUT)
    bfin = p["b4"] @ w5a + p["b4"] @ w5b + p["b5"]

    blob = jnp.zeros((BLOB_ROWS, LANES), jnp.float32)
    # Layer-1 weights: one (IN,H1) block per tower, each in its own 8-row tile.
    blob = blob.at[OFF_W1A:OFF_W1A + IN, 0:H1].set(w1f)            # A -> lanes 0:32
    blob = blob.at[OFF_W1B:OFF_W1B + IN, H1:2 * H1].set(w1f)       # B -> lanes 32:64
    # Bias rows (one 8-row tile, rows 0..3); lanes beyond the live block stay 0.
    blob = blob.at[OFF_B + 0:OFF_B + 1, 0:2 * H1].set(jnp.concatenate([b1f, b1f], -1))
    blob = blob.at[OFF_B + 1:OFF_B + 2, 0:2 * H2].set(jnp.concatenate([b2f, b2f], -1))
    blob = blob.at[OFF_B + 2:OFF_B + 3, 0:2 * H3].set(jnp.concatenate([b3f, b3f], -1))
    blob = blob.at[OFF_B + 3:OFF_B + 4, 0:OUT].set(bfin)
    # Layer-2 block-diagonal live rows (K-rows 0:64 of its 128-row view).
    blob = blob.at[OFF_W2:OFF_W2 + H1, 0:H2].set(w2f)
    blob = blob.at[OFF_W2 + H1:OFF_W2 + 2 * H1, H2:2 * H2].set(w2f)
    # Fused-final live rows (K-rows 0:64 of its 128-row view).
    blob = blob.at[OFF_WF:OFF_WF + H3, 0:OUT].set(w45a)
    blob = blob.at[OFF_WF + H3:OFF_WF + 2 * H3, 0:OUT].set(w45b)
    # Layer-3 block-diagonal (all 128 K-rows live).
    blob = blob.at[OFF_W3:OFF_W3 + H2, 0:H3].set(w3f)
    blob = blob.at[OFF_W3 + H2:OFF_W3 + 2 * H2, H3:2 * H3].set(w3f)
    return blob


# ------------------------------- reference -----------------------------------
def _reference_forward(x, features, p):
    """Pure-JAX reference with the original (unfolded) parameters, eval mode."""

    def tower(z):
        h = z @ p["w1"] + p["b1"]
        h = jnp.maximum(h * p["s1"] + p["t1"], 0.0)
        h = h @ p["w2"] + p["b2"]
        h = h * p["s2"] + p["t2"]
        h = jnp.where(h > 0.0, h, 0.01 * h)
        h = h @ p["w3"] + p["b3"]
        h = jnp.maximum(h * p["s3"] + p["t3"], 0.0)
        return h @ p["w4"] + p["b4"]

    y = jnp.concatenate([tower(x), tower(features)], axis=-1)
    return y @ p["w5"] + p["b5"]


# --------------------------------- main --------------------------------------
if __name__ == "__main__":
    # TODO(synk): training-mode Dropout / batch-stat BatchNorm are not
    # implemented; this kernel is the eval-mode forward pass only.
    batch_size = 8

    key = jax.random.PRNGKey(0)
    kx, kf, kp = jax.random.split(key, 3)
    x = jax.random.normal(kx, (batch_size, IN), jnp.float32)
    features = jax.random.normal(kf, (batch_size, IN), jnp.float32)
    raw_params, blob = init_params(kp)

    out = jax.block_until_ready(force_model_forward(x, features, blob))

    ref = _reference_forward(x, features, raw_params)
    assert out.shape == (batch_size, OUT)
    assert jnp.allclose(out, ref, atol=5e-4, rtol=1e-3), (out, ref)

    print("KERNEL_OK")
</pallas_src>

<mosaic_0001>
module attributes {stable_mosaic.version = 11 : i64} {
  func.func @_force_model_kernel(%arg0: i32, %arg1: memref<8x3xf32, #tpu.memory_space<vmem>>, %arg2: memref<8x3xf32, #tpu.memory_space<vmem>>, %arg3: memref<280x128xf32, #tpu.memory_space<vmem>>, %arg4: memref<8x128xf32, #tpu.memory_space<vmem>>) attributes {dimension_semantics = [#tpu.dimension_semantics<parallel>], iteration_bounds = array<i64: 1>, scalar_prefetch = 0 : i64, scratch_operands = 0 : i64, tpu.core_type = #tpu.core_type<tc>, window_params = [{transform_indices = @transform_0, window_bounds = array<i64: 8, 3>}, {transform_indices = @transform_1, window_bounds = array<i64: 8, 3>}, {pipeline_mode = #tpu.pipeline_mode<synchronous>, transform_indices = @transform_2, window_bounds = array<i64: 280, 128>}, {transform_indices = @transform_3, window_bounds = array<i64: 8, 128>}]} {
    %c0 = arith.constant 0 : index
    %c0_0 = arith.constant 0 : index
    %0 = vector.load %arg3[%c0, %c0_0] : memref<280x128xf32, #tpu.memory_space<vmem>>, vector<3x128xf32>
    %c8 = arith.constant 8 : index
    %c0_1 = arith.constant 0 : index
    %1 = vector.load %arg3[%c8, %c0_1] : memref<280x128xf32, #tpu.memory_space<vmem>>, vector<3x128xf32>
    %c16 = arith.constant 16 : index
    %c0_2 = arith.constant 0 : index
    %2 = vector.load %arg3[%c16, %c0_2] : memref<280x128xf32, #tpu.memory_space<vmem>>, vector<8x128xf32>
    %c24 = arith.constant 24 : index
    %c0_3 = arith.constant 0 : index
    %3 = vector.load %arg3[%c24, %c0_3] : memref<280x128xf32, #tpu.memory_space<vmem>>, vector<128x128xf32>
    %c88 = arith.constant 88 : index
    %c0_4 = arith.constant 0 : index
    %4 = vector.load %arg3[%c88, %c0_4] : memref<280x128xf32, #tpu.memory_space<vmem>>, vector<128x128xf32>
    %c152 = arith.constant 152 : index
    %c0_5 = arith.constant 0 : index
    %5 = vector.load %arg3[%c152, %c0_5] : memref<280x128xf32, #tpu.memory_space<vmem>>, vector<128x128xf32>
    %6 = vector.extract_strided_slice %2 {offsets = [0, 0], sizes = [1, 128], strides = [1, 1]} : vector<8x128xf32> to vector<1x128xf32>
    %7 = vector.extract_strided_slice %2 {offsets = [1, 0], sizes = [1, 128], strides = [1, 1]} : vector<8x128xf32> to vector<1x128xf32>
    %8 = vector.extract_strided_slice %2 {offsets = [2, 0], sizes = [1, 128], strides = [1, 1]} : vector<8x128xf32> to vector<1x128xf32>
    %9 = vector.extract_strided_slice %2 {offsets = [3, 0], sizes = [1, 128], strides = [1, 1]} : vector<8x128xf32> to vector<1x128xf32>
    %c0_6 = arith.constant 0 : index
    %c0_7 = arith.constant 0 : index
    %10 = vector.load %arg1[%c0_6, %c0_7] : memref<8x3xf32, #tpu.memory_space<vmem>>, vector<8x3xf32>
    %c0_8 = arith.constant 0 : index
    %c0_9 = arith.constant 0 : index
    %11 = vector.load %arg2[%c0_8, %c0_9] : memref<8x3xf32, #tpu.memory_space<vmem>>, vector<8x3xf32>
    %cst = arith.constant dense<0.000000e+00> : vector<8x128xf32>
    %12 = tpu.matmul %10, %0, %cst {dimension_numbers = #tpu.dot_dimension_numbers<[1], [0], [0], [1], [0, 0, 1, 1], [], []>} : vector<8x3xf32>, vector<3x128xf32>, vector<8x128xf32> -> vector<8x128xf32>
    %cst_10 = arith.constant dense<0.000000e+00> : vector<8x128xf32>
    %13 = tpu.matmul %11, %1, %cst_10 {dimension_numbers = #tpu.dot_dimension_numbers<[1], [0], [0], [1], [0, 0, 1, 1], [], []>} : vector<8x3xf32>, vector<3x128xf32>, vector<8x128xf32> -> vector<8x128xf32>
    %14 = arith.addf %12, %13 : vector<8x128xf32>
    %15 = vector.broadcast %6 : vector<1x128xf32> to vector<8x128xf32>
    %16 = arith.addf %14, %15 : vector<8x128xf32>
    %cst_11 = arith.constant 0.000000e+00 : f32
    %17 = vector.broadcast %cst_11 : f32 to vector<8x128xf32>
    %18 = arith.maximumf %16, %17 : vector<8x128xf32>
    %cst_12 = arith.constant dense<0.000000e+00> : vector<8x128xf32>
    %19 = tpu.matmul %18, %3, %cst_12 {dimension_numbers = #tpu.dot_dimension_numbers<[1], [0], [0], [1], [0, 0, 1, 1], [], []>} : vector<8x128xf32>, vector<128x128xf32>, vector<8x128xf32> -> vector<8x128xf32>
    %20 = vector.broadcast %7 : vector<1x128xf32> to vector<8x128xf32>
    %21 = arith.addf %19, %20 : vector<8x128xf32>
    %cst_13 = arith.constant 0.00999999977 : f32
    %22 = vector.broadcast %cst_13 : f32 to vector<8x128xf32>
    %23 = arith.mulf %22, %21 : vector<8x128xf32>
    %24 = arith.maximumf %21, %23 : vector<8x128xf32>
    %cst_14 = arith.constant dense<0.000000e+00> : vector<8x128xf32>
    %25 = tpu.matmul %24, %5, %cst_14 {dimension_numbers = #tpu.dot_dimension_numbers<[1], [0], [0], [1], [0, 0, 1, 1], [], []>} : vector<8x128xf32>, vector<128x128xf32>, vector<8x128xf32> -> vector<8x128xf32>
    %26 = vector.broadcast %8 : vector<1x128xf32> to vector<8x128xf32>
    %27 = arith.addf %25, %26 : vector<8x128xf32>
    %cst_15 = arith.constant 0.000000e+00 : f32
    %28 = vector.broadcast %cst_15 : f32 to vector<8x128xf32>
    %29 = arith.maximumf %27, %28 : vector<8x128xf32>
    %cst_16 = arith.constant dense<0.000000e+00> : vector<8x128xf32>
    %30 = tpu.matmul %29, %4, %cst_16 {dimension_numbers = #tpu.dot_dimension_numbers<[1], [0], [0], [1], [0, 0, 1, 1], [], []>} : vector<8x128xf32>, vector<128x128xf32>, vector<8x128xf32> -> vector<8x128xf32>
    %31 = vector.broadcast %9 : vector<1x128xf32> to vector<8x128xf32>
    %32 = arith.addf %30, %31 : vector<8x128xf32>
    %c0_17 = arith.constant 0 : index
    %c0_18 = arith.constant 0 : index
    %33 = vector.load %arg4[%c0_17, %c0_18] : memref<8x128xf32, #tpu.memory_space<vmem>>, vector<8x128xf32>
    tpu.vector_store %arg4[%c0_17, %c0_18], %32 {strides = array<i32>} : memref<8x128xf32, #tpu.memory_space<vmem>>, vector<8x128xf32>,
    return
  }
  func.func @transform_0(%arg0: i32) -> (i32, i32) {
    %c0_i32 = arith.constant 0 : i32
    %c0_i32_0 = arith.constant 0 : i32
    return %arg0, %c0_i32 : i32, i32
  }
  func.func @transform_1(%arg0: i32) -> (i32, i32) {
    %c0_i32 = arith.constant 0 : i32
    %c0_i32_0 = arith.constant 0 : i32
    return %arg0, %c0_i32 : i32, i32
  }
  func.func @transform_2(%arg0: i32) -> (i32, i32) {
    %c0_i32 = arith.constant 0 : i32
    %c0_i32_0 = arith.constant 0 : i32
    %c0_i32_1 = arith.constant 0 : i32
    return %c0_i32, %c0_i32_0 : i32, i32
  }
  func.func @transform_3(%arg0: i32) -> (i32, i32) {
    %c0_i32 = arith.constant 0 : i32
    %c0_i32_0 = arith.constant 0 : i32
    return %arg0, %c0_i32 : i32, i32
  }
}

</mosaic_0001>

<bundles_post_ra>
// kernel: tpu_custom_call.1
= control target key start
LH: loop header
LB: loop body
LE: loop exit
PB: predicated region body
PF: predicated region fallthrough
CT: control target
= control target key end

     0   :  { %8 = vsyncpa [#allocation3], 0  ;;  %s871_s0 = inlined_call_operand.vmem [shape: f32[8,3], index: 0, kind: input, shape index: {}]   ;;  %s872_s1 = inlined_call_operand.vmem [shape: f32[8,3], index: 1, kind: input, shape index: {}]   ;;  %s873_s2 = inlined_call_operand.hbm [shape: f32[280,128], index: 2, kind: input, shape index: {}]   ;;  %s874_s3 = inlined_call_operand.hbm [shape: f32[8,128], index: 3, kind: output, shape index: {}]  }
   0x1   :  { %9 = vsyncpa [#allocation4], 0  ;;  %s776_s12 = smov [#allocation2]   ;;  %s728_s16 = scalar_lea.hbm %s873_s2, 4480 }
   0x2   :  { %s19_s13 = sshll.u32 %s776_s12, 4  ;;  %p729_p0 = scmp.ne.s32.totalorder %s873_s2, %s728_s16  ;;  %s20_s13 = int_to_ptr.vmem [resolvable:$true] %s19_s13 }
   0x3   :  { %p732_p1 = scmp.lt.u32.totalorder %s728_s16, %s873_s2 }
   0x5   :  { %p734_p2 = pnand %p732_p1, %p729_p0 }
   0x7   :  { %737 = shalt.err (!%p734_p2)
}
   0x8   :  { %s738_s21 = scalar_lea.vmem %s20_s13, 4480  ;;  %p743_p4 = scmp.lt.s32.totalorder %s20_s13, %s20_s13 }
   0x9   :  { %p739_p3 = scmp.ne.s32.totalorder %s20_s13, %s738_s21  ;;  %p744_p5 = scmp.lt.s32.totalorder %s738_s21, %s738_s21 }
   0xb   :  { %p745_p6 = por %p744_p5, %p743_p4 }
   0xd   :  { %p746_p7 = pnand %p745_p6, %p739_p3 }
   0xf   :  { %749 = shalt.err (!%p746_p7)
}
  0x10   :  { %s777_s22 = smov 128   ;;  %s778_s23 = smov 8  }
  0x11   :  { %25 = dma.hbm_to_vmem [thread:$0]  %s873_s2, 4480, %s20_s13, [#allocation3], %s777_s22, %s777_s22, %s778_s23  }
  0x12   :  { %772 = dma.done.wait [#allocation3], 4480  }
  0x13   :  { %773 = vsyncadd [#allocation3], 4294962816  ;;  %v779_v0 = vmov 0.0   ;;  %vm780_vm0 = vmmov 0   ;;  %v781_v1 = vmov 0.0|0.0   ;;  %vm78_vm1 = vcmask 1042432  }
  0x14   :  { %534 = vmatprep.subr.mxu1 %v779_v0  ;;  %536 = vmatprep.mubr.msk.f32.mxu1 %vm780_vm0, %v779_v0  ;;  %vm74_vm2 = vcmask 23552   ;;  %v30_v2 = vld [vmem:[#allocation2 + $0x8] sm:$0x7]  ;;  %v73_v3 = vld [vmem:[%s872_s1] sm:$0xff]  ;;  %v32_v5 = vld [vmem:[#allocation2 + $0x18] sm:$0xff]  ;;  %v228_v48 = vlaneseq }
  0x15   :  { %649 = vmatprep.subr.bf16.mxu0 %v781_v1  ;;  %576 = vmatprep.mubr.msk.f32.mxu0 %vm780_vm0, %v779_v0  ;;  %v29_v4 = vld [vmem:[#allocation2] sm:$0x7]  ;;  %v34_v8 = vld [vmem:[#allocation2 + $0x28] sm:$0xff]  ;;  %v35_v9 = vld [vmem:[#allocation2 + $0x30] sm:$0xff] }
  0x16   :  { %535 = vmatpush3.msk.msra.mxu1 %vm78_vm1, %v30_v2  ;;  %v33_v6 = vld [vmem:[#allocation2 + $0x20] sm:$0xff]  ;;  %v653_v11 = vpack.c.bf16 %v35_v9, %v34_v8  ;;  %v36_v12 = vld [vmem:[#allocation2 + $0x38] sm:$0xff]  ;;  %v38_v15 = vld [vmem:[#allocation2 + $0x48] sm:$0xff]  ;;  %v229_v49 = vshrl.u32 %v228_v48, 7 }
  0x17   :  { %537 = vmatmul.mubr.msk.f32.vlgmr.msra.gmra.mrb[0].mxu1 %vm74_vm2, %v73_v3  ;;  %539 = vmatprep.subr.mxu1 %v779_v0  ;;  %v650_v7 = vpack.c.bf16 %v33_v6, %v32_v5  ;;  %v72_v10 = vld [vmem:[%s871_s0] sm:$0xff]  ;;  %v39_v16 = vld [vmem:[#allocation2 + $0x50] sm:$0xff]  ;;  %v40_v18 = vld [vmem:[#allocation2 + $0x58] sm:$0xff]  ;;  %s782_s0 = smov [#allocation5]  }
  0x18   :  { %540 = vmatpush3.msk.msra.mxu1 %vm78_vm1, %v29_v4  ;;  %541 = vmatprep.mubr.msk.f32.mxu1 %vm780_vm0, %v779_v0  ;;  %v37_v13 = vld [vmem:[#allocation2 + $0x40] sm:$0xff]  ;;  %v659_v17 = vpack.c.bf16 %v39_v16, %v38_v15  ;;  %v42_v21 = vld [vmem:[#allocation2 + $0x68] sm:$0xff]  ;;  %v43_v22 = vld [vmem:[#allocation2 + $0x70] sm:$0xff]  ;;  %v230_v50 = vsub.s32 0, %v229_v49  ;;  %v236_v3 = vsub.s32 1, %v229_v49  ;;  %s466_s1 = sshll.u32 %s782_s0, 4  ;;  %s467_s1 = int_to_ptr.vmem [resolvable:$true] %s466_s1 }
  0x19   :  { %651 = vmatpush3.bf16.msra.mxu0 %v650_v7  ;;  %673 = vmatprep.subr.bf16.mxu1 %v781_v1  ;;  %v656_v14 = vpack.c.bf16 %v37_v13, %v36_v12  ;;  %v41_v19 = vld [vmem:[#allocation2 + $0x60] sm:$0xff]  ;;  %v665_v23 = vpack.c.bf16 %v43_v22, %v42_v21  ;;  %v44_v24 = vld [vmem:[#allocation2 + $0x78] sm:$0xff]  ;;  %v46_v27 = vld [vmem:[#allocation2 + $0x88] sm:$0xff]  ;;  %s750_s29 = scalar_lea.vmem %s467_s1, 128  ;;  %p755_p9 = scmp.lt.s32.totalorder %s467_s1, %s467_s1 }
  0x1a   :  { %652 = vmatprep.subr.bf16.mxu0 %v781_v1  ;;  %v662_v20 = vpack.c.bf16 %v41_v19, %v40_v18  ;;  %v45_v25 = vld [vmem:[#allocation2 + $0x80] sm:$0xff]  ;;  %v47_v28 = vld [vmem:[#allocation2 + $0x90] sm:$0xff]  ;;  %v56_v30 = vld [vmem:[#allocation2 + $0x98] sm:$0xff]  ;;  %p751_p8 = scmp.ne.s32.totalorder %s467_s1, %s750_s29  ;;  %p756_p10 = scmp.lt.s32.totalorder %s750_s29, %s750_s29 }
  0x1b   :  { %542 = vmatmul.mubr.msk.f32.vlgmr.msra.gmra.mrb[2].mxu1 %vm74_vm2, %v72_v10  ;;  %v668_v26 = vpack.c.bf16 %v45_v25, %v44_v24  ;;  %v671_v29 = vpack.c.bf16 %v47_v28, %v46_v27  ;;  %v57_v31 = vld [vmem:[#allocation2 + $0xa0] sm:$0xff]  ;;  %v58_v32 = vld [vmem:[#allocation2 + $0xa8] sm:$0xff]  ;;  %v59_v34 = vld [vmem:[#allocation2 + $0xb0] sm:$0xff]  ;;  %v312_v10 = vsub.s32 2, %v229_v49 }
  0x1c   :  { %611 = vmatprep.mubr.msk.f32.mxu1 %vm780_vm0, %v779_v0  ;;  %v674_v33 = vpack.c.bf16 %v57_v31, %v56_v30  ;;  %v677_v35 = vpack.c.bf16 %v59_v34, %v58_v32  ;;  %v60_v36 = vld [vmem:[#allocation2 + $0xb8] sm:$0xff]  ;;  %v61_v37 = vld [vmem:[#allocation2 + $0xc0] sm:$0xff]  ;;  %v62_v39 = vld [vmem:[#allocation2 + $0xc8] sm:$0xff]  ;;  %p757_p11 = por %p756_p10, %p755_p9 }
  0x1d   :  { %654 = vmatpush3.bf16.msra.mxu0 %v653_v11  ;;  %v680_v38 = vpack.c.bf16 %v61_v37, %v60_v36  ;;  %v63_v40 = vld [vmem:[#allocation2 + $0xd0] sm:$0xff]  ;;  %v64_v42 = vld [vmem:[#allocation2 + $0xd8] sm:$0xff]  ;;  %v65_v43 = vld [vmem:[#allocation2 + $0xe0] sm:$0xff] }
  0x1e   :  { %655 = vmatprep.subr.bf16.mxu0 %v781_v1  ;;  %675 = vmatpush3.bf16.msra.mxu1 %v674_v33  ;;  %v683_v41 = vpack.c.bf16 %v63_v40, %v62_v39  ;;  %v686_v44 = vpack.c.bf16 %v65_v43, %v64_v42  ;;  %v66_v45 = vld [vmem:[#allocation2 + $0xe8] sm:$0xff]  ;;  %v67_v46 = vld [vmem:[#allocation2 + $0xf0] sm:$0xff]  ;;  %v68_v60 = vld [vmem:[#allocation2 + $0xf8] sm:$0xff]  ;;  %p758_p12 = pnand %p757_p11, %p751_p8 }
  0x1f   :  { %676 = vmatprep.subr.bf16.mxu1 %v781_v1  ;;  %v689_v47 = vpack.c.bf16 %v67_v46, %v66_v45  ;;  %v31_v52 = vld [vmem:[#allocation2 + $0x10] sm:$0xff]  ;;  %v69_v61 = vld [vmem:[#allocation2 + $0x100] sm:$0xff]  ;;  %v70_v63 = vld [vmem:[#allocation2 + $0x108] sm:$0xff] }
  0x20   :  { %v231_v54 = vrot.slane %v31_v52, %v230_v50  ;;  %v692_v62 = vpack.c.bf16 %v69_v61, %v68_v60  ;;  %v237_v4 = vrot.slane %v31_v52, %v236_v3  ;;  %v313_v11 = vrot.slane %v31_v52, %v312_v10 }
  0x21   :  { %657 = vmatpush3.bf16.msra.mxu0 %v656_v14 }
  0x22   :  { %658 = vmatprep.subr.bf16.mxu0 %v781_v1  ;;  %678 = vmatpush3.bf16.msra.mxu1 %v677_v35 }
  0x23   :  { %679 = vmatprep.subr.bf16.mxu1 %v781_v1 }
  0x25   :  { %660 = vmatpush3.bf16.msra.mxu0 %v659_v17 }
  0x26   :  { %661 = vmatprep.subr.bf16.mxu0 %v781_v1  ;;  %681 = vmatpush3.bf16.msra.mxu1 %v680_v38 }
  0x27   :  { %682 = vmatprep.subr.bf16.mxu1 %v781_v1 }
  0x29   :  { %663 = vmatpush3.bf16.msra.mxu0 %v662_v20 }
  0x2a   :  { %664 = vmatprep.subr.bf16.mxu0 %v781_v1  ;;  %684 = vmatpush3.bf16.msra.mxu1 %v683_v41 }
  0x2b   :  { %685 = vmatprep.subr.bf16.mxu1 %v781_v1 }
  0x2d   :  { %666 = vmatpush3.bf16.msra.mxu0 %v665_v23 }
  0x2e   :  { %667 = vmatprep.subr.bf16.mxu0 %v781_v1  ;;  %687 = vmatpush3.bf16.msra.mxu1 %v686_v44 }
  0x2f   :  { %688 = vmatprep.subr.bf16.mxu1 %v781_v1 }
  0x31   :  { %669 = vmatpush3.bf16.msra.mxu0 %v668_v26 }
  0x32   :  { %670 = vmatprep.subr.bf16.mxu0 %v781_v1  ;;  %690 = vmatpush3.bf16.msra.mxu1 %v689_v47 }
  0x33   :  { %691 = vmatprep.subr.bf16.mxu1 %v781_v1 }
  0x35   :  { %672 = vmatpush3.bf16.msra.mxu0 %v671_v29 }
  0x36   :  { %697 = vmatprep.subr.bf16.mxu0 %v781_v1  ;;  %693 = vmatpush3.bf16.msra.mxu1 %v692_v62 }
  0x37   :  { %694 = vmatprep.subr.bf16.mxu1 %v781_v1 }
  0xea   :  { %v148_v51 = vpop.f32.mrb[0].mxu1 }
  0xeb   :  { %v538_v53 = vpop.f32.mrb[1].mxu1 }
  0xee   :  { %v224_v55 = vpop.f32.mrb[2].mxu1 }
  0xef   :  { %v225_v56 = vadd.f32 %v224_v55, %v148_v51  ;;  %v543_v57 = vpop.f32.mrb[3].mxu1 }
  0xf1   :  { %v232_v58 = vadd.f32 %v231_v54, %v225_v56 }
  0xf3   :  { %v233_v59 = vmax.f32 %v232_v58, 0.0 }
  0xf5   :  { %577 = vmatmul.mubr.f32.vlgmr.msra.gmra.mrb[0].mxu0 %v233_v59 }
  0xf6   :  { %699 = vmatpush3.bf16.msra.mxu0 %v662_v20  ;;  %646 = vmatprep.mubr.msk.f32.mxu0 %vm780_vm0, %v779_v0  ;;  %v71_v0 = vld [vmem:[#allocation2 + $0x110] sm:$0xff] }
  0xf7   :  { %700 = vmatprep.subr.bf16.mxu0 %v781_v1  ;;  %v695_v2 = vpack.c.bf16 %v71_v0, %v70_v63 }
  0xf9   :  { %696 = vmatpush3.bf16.msra.mxu1 %v695_v2 }
  0xfa   :  { %702 = vmatpush3.bf16.msra.mxu0 %v665_v23 }
  0xfb   :  { %703 = vmatprep.subr.bf16.mxu0 %v781_v1 }
  0xfe   :  { %705 = vmatpush3.bf16.msra.mxu0 %v668_v26 }
  0xff   :  { %706 = vmatprep.subr.bf16.mxu0 %v781_v1 }
 0x102   :  { %708 = vmatpush3.bf16.msra.mxu0 %v671_v29 }
 0x103   :  { %709 = vmatprep.subr.bf16.mxu0 %v781_v1 }
 0x106   :  { %711 = vmatpush3.bf16.msra.mxu0 %v674_v33 }
 0x107   :  { %712 = vmatprep.subr.bf16.mxu0 %v781_v1 }
 0x10a   :  { %714 = vmatpush3.bf16.msra.mxu0 %v677_v35 }
 0x10b   :  { %715 = vmatprep.subr.bf16.mxu0 %v781_v1 }
 0x10e   :  { %717 = vmatpush3.bf16.msra.mxu0 %v680_v38 }
 0x10f   :  { %718 = vmatprep.subr.bf16.mxu0 %v781_v1  ;;  %v387_v1 = vsub.s32 3, %v229_v49 }
 0x111   :  { %v388_v16 = vrot.slane %v31_v52, %v387_v1 }
 0x112   :  { %720 = vmatpush3.bf16.msra.mxu0 %v683_v41 }
 0x1c8   :  { %v304_v5 = vpop.f32.mrb[0].mxu0 }
 0x1c9   :  { %v305_v6 = vadd.f32 %v304_v5, %v237_v4  ;;  %v578_v7 = vpop.f32.mrb[1].mxu0 }
 0x1cb   :  { %v308_v8 = vmul.f32 0.01, %v305_v6 }
 0x1cd   :  { %v309_v9 = vmax.f32 %v305_v6, %v308_v8 }
 0x1cf   :  { %612 = vmatmul.mubr.f32.vlgmr.msra.gmra.mrb[4].mxu1 %v309_v9 }
 0x2a2   :  { %v380_v12 = vpop.f32.mrb[4].mxu1 }
 0x2a3   :  { %v381_v13 = vadd.f32 %v380_v12, %v313_v11  ;;  %v613_v14 = vpop.f32.mrb[5].mxu1 }
 0x2a5   :  { %v384_v15 = vmax.f32 %v381_v13, 0.0 }
 0x2a7   :  { %647 = vmatmul.mubr.f32.vlgmr.msra.gmra.mrb[2].mxu0 %v384_v15 }
 0x37a   :  { %v455_v17 = vpop.f32.mrb[2].mxu0 }
 0x37b   :  { %v456_v18 = vadd.f32 %v455_v17, %v388_v16  ;;  %v648_v19 = vpop.f32.mrb[3].mxu0 }
 0x37d   :  { %459 = vst [vmem:[#allocation5] sm:$0xff] %v456_v18 }
 0x37e   :  { %761 = shalt.err (!%p758_p12)
}
 0x37f   :  { %s762_s5 = scalar_lea.hbm %s874_s3, 128 }
 0x380   :  { %p763_p13 = scmp.ne.s32.totalorder %s874_s3, %s762_s5  ;;  %p766_p0 = scmp.lt.u32.totalorder %s762_s5, %s874_s3 }
 0x382   :  { %p768_p1 = pnand %p766_p0, %p763_p13 }
 0x384   :  { %771 = shalt.err (!%p768_p1)
}
 0x385   :  { %469 = dma.vmem_to_hbm [thread:$0]  %s467_s1, 128, %s874_s3, [#allocation4]  }
 0x386   :  { %774 = dma.done.wait [#allocation4], 128  }
 0x387   :  { %775 = vsyncadd [#allocation4], 4294967168 }
 0x388   :  { %473 = vsyncpa [#allocation3], 1 }
 0x389   :  { %474 = vsyncpa [#allocation4], 1 }

</bundles_post_ra>
